<compile_context>
chip_gen: v7x
topology: tpu7x:2x2x1
jax: 0.10.0
libtpu: 0.0.40
codegen_flags: <defaults>
</compile_context>

<pallas_src>
import functools

import jax
import jax.numpy as jnp
import numpy as np
from jax.experimental import pallas as pl
from jax.experimental.pallas import tpu as pltpu


def _gather_matrix(g: int, w: int, s: int, cols_out: int) -> np.ndarray:
    """One-hot (g*w, cols_out) matrix: output column c copies input column src(c).

    Column index c is interpreted in the final output layout
    (h_local, i, ow) with ow = w_src*s + j; it reads input column
    h_local*w + ow//s.  For the reduced-R regime (g=1, cols_out=s*w) this
    collapses to R[w_src, w_src*s + j] = 1.
    """
    col = np.arange(cols_out)
    ssw = s * s * w
    h_local = col // ssw
    ow = (col % ssw) % (s * w)
    src = h_local * w + ow // s
    mat = np.zeros((g * w, cols_out), dtype=np.float32)
    mat[src, col] = 1.0
    return mat


def _pick_rows_per_block(rows: int, q: int, cap: int) -> int:
    """Sublane-aligned row-block size; prefers no padding and an even step count."""
    cap = max(q, min(cap, rows))
    best_any = None
    best_even = None
    t = (cap // q) * q
    while t >= q:
        if rows % t == 0:
            if best_any is None:
                best_any = t
            if (rows // t) % 2 == 0:
                best_even = t          # largest aligned divisor with even #steps
                break
        t -= q
    if best_even is not None:
        return best_even
    if best_any is not None and rows // best_any >= 2:
        return best_any
    if rows <= cap:
        return rows                    # single full-extent block: no pad, no alignment needed
    if best_any is not None:
        return best_any
    # Padding fallback (rare): aligned block near the cap, aim for an even #steps.
    t = max(q, (cap // q) * q)
    steps = pl.cdiv(rows, t)
    if steps > 1 and steps % 2 == 1:
        t = max(q, pl.cdiv(pl.cdiv(rows, steps + 1), q) * q)
    return t


def _upsample_kernel(x_ref, r_ref, o_ref, *, reps, precision):
    # x_ref: (TR, g*W)            row-blocked input
    # r_ref: (g*W, cols_out)      constant one-hot gather matrix
    # o_ref: (TR, reps*cols_out)  lane-dense output block
    y = jnp.dot(
        x_ref[...],
        r_ref[...],
        preferred_element_type=jnp.float32,
        precision=precision,
    ).astype(o_ref.dtype)
    if reps > 1:
        # H-replication: `reps` identical copies side by side along lanes.
        # Free relative to re-doing the matmul for each replica (review #1).
        y = jnp.concatenate([y] * reps, axis=-1)
    o_ref[...] = y


@functools.partial(jax.jit, static_argnames=("scale_factor",))
def anisotropic_upsample_pallas(x, scale_factor):
    """x: (N, C, D, H, W) -> (N, C, D, s*H, s*W), nearest-neighbour in H/W only."""
    s = int(scale_factor)
    assert s >= 1
    N, C, D, H, W = x.shape
    assert jnp.issubdtype(x.dtype, jnp.floating), "floating-point inputs only"
    # TODO(synk): integer dtypes would need a non-matmul copy path.
    # TODO(synk): non-integer scale factors (PyTorch allows them) are not supported.

    itemsize = jnp.dtype(x.dtype).itemsize
    out_last = s * s * W  # columns produced per input (n, c, d, h) row

    # ---- regime selection ----------------------------------------------------
    if out_last >= 128 or H == 1:
        # Normal regime: reduced R (W, s*W) + lane-axis concat of the s replicas.
        g, reps = 1, s
    else:
        # Small-spatial regime (review #4): fold g rows of H into the matmul so
        # the output block is lane-dense (target >= 256 output lanes).
        g_target = max(1, 256 // out_last)
        g = 1
        for cand in range(min(H, g_target), 0, -1):
            if H % cand == 0:
                g = cand
                break
        reps = 1 if g > 1 else s

    win = g * W                        # input-row width fed to the MXU
    out_cols = g * s * s * W           # output-row width written per block
    cols_out = out_cols // reps        # columns produced by the matmul itself
    rows = (N * C * D * H) // g

    x2 = x.reshape(rows, win)
    rep = jnp.asarray(_gather_matrix(g, W, s, cols_out), dtype=x.dtype)

    # ---- precision (review #2) ----------------------------------------------
    if x.dtype == jnp.float32:
        precision = jax.lax.Precision.HIGHEST   # exact copy (see header comment)
        passes = 6
    else:
        precision = None                        # bf16/f16 are MXU-native; exact with f32 acc
        passes = 1

    # ---- VMEM accounting (review #5/#6/#10) ----------------------------------
    try:
        vmem_cap = int(getattr(pltpu.get_tpu_info(), "vmem_capacity_bytes", 64 << 20))
    except Exception:
        vmem_cap = 64 << 20            # smallest per-core VMEM across v5e/v6e/v7x

    r_full_bytes = win * cols_out * itemsize
    r_single_buffered = r_full_bytes > (2 << 20)
    r_resident = r_full_bytes * (1 if r_single_buffered else 2)

    ws_target = min(vmem_cap // 3, 24 << 20)            # double-buffered blocks + R
    blk_bytes_per_row = 2 * (win + out_cols) * itemsize  # x2 for double buffering
    q = {4: 8, 2: 16, 1: 32}.get(itemsize, 8)            # dtype-aware sublane quantum (review #9)
    tr_cap = min(2048, max(q, (ws_target - r_resident) // blk_bytes_per_row))

    tr = _pick_rows_per_block(rows, q, tr_cap)           # review #7/#8
    grid_rows = pl.cdiv(rows, tr)
    rows_pad = grid_rows * tr
    if rows_pad != rows:               # rare fallback; usually a divisor exists
        x2 = jnp.pad(x2, ((0, rows_pad - rows), (0, 0)))

    ws_est = tr * blk_bytes_per_row + r_resident
    vmem_limit = int(min(int(0.9 * vmem_cap), max(32 << 20, ws_est + (8 << 20))))

    r_spec_kwargs = {}
    if r_single_buffered:
        # Constant-index R is never re-fetched; single-buffer it (review #10).
        r_spec_kwargs["pipeline_mode"] = pl.Buffered(1)

    out = pl.pallas_call(
        functools.partial(_upsample_kernel, reps=reps, precision=precision),
        out_shape=jax.ShapeDtypeStruct((rows_pad, out_cols), x.dtype),
        grid=(grid_rows,),
        in_specs=[
            pl.BlockSpec((tr, win), lambda i: (i, 0)),
            pl.BlockSpec((win, cols_out), lambda i: (0, 0), **r_spec_kwargs),
        ],
        out_specs=pl.BlockSpec((tr, out_cols), lambda i: (i, 0)),
        compiler_params=pltpu.CompilerParams(
            dimension_semantics=("parallel",),
            vmem_limit_bytes=vmem_limit,
        ),
        cost_estimate=pl.CostEstimate(                      # review #11
            flops=2 * rows_pad * win * cols_out * passes,
            transcendentals=0,
            bytes_accessed=(rows_pad * (win + out_cols) + win * cols_out) * itemsize,
        ),
    )(x2, rep)

    if rows_pad != rows:
        out = out[:rows]
    # Row-major metadata-only reshape: (rows, g*s*s*W) == (N, C, D, H//g, g, s, s*W)
    # -> (N, C, D, s*H, s*W).  No data movement.
    return out.reshape(N, C, D, s * H, s * W)


class Upsample:
    """Minimal port of inferno's Upsample (nearest / scale_factor path only)."""

    def __init__(self, size=None, scale_factor=None, mode="nearest", align_corners=None):
        assert mode == "nearest" and size is None and align_corners is None
        self.size = size
        self.scale_factor = scale_factor
        self.mode = mode
        self.align_corners = align_corners


class AnisotropicUpsample:
    """JAX/Pallas port of inferno's AnisotropicUpsample."""

    def __init__(self, scale_factor):
        self.upsampler = Upsample(scale_factor=scale_factor)

    def __call__(self, x):
        assert x.ndim == 5, "expected (N, C, D, H, W)"
        return anisotropic_upsample_pallas(x, int(self.upsampler.scale_factor))


def _reference_anisotropic_upsample(x, s):
    """Pure-JAX reference: nearest-neighbour repeat of H and W by s."""
    return jnp.repeat(jnp.repeat(x, s, axis=3), s, axis=4)


if __name__ == "__main__":
    key = jax.random.PRNGKey(0)
    k1, k2, k3 = jax.random.split(key, 3)

    # 1) Primary case (small spatial -> folded-H lane-dense regime), f32.
    x1 = jax.random.normal(k1, (2, 3, 4, 8, 8), dtype=jnp.float32)
    m2 = AnisotropicUpsample(scale_factor=2)
    o1 = jax.block_until_ready(m2(x1))
    assert o1.shape == (2, 3, 4, 16, 16), o1.shape
    np.testing.assert_allclose(
        np.asarray(o1), np.asarray(_reference_anisotropic_upsample(x1, 2)),
        rtol=1e-6, atol=1e-6)

    # 2) Lane-dense reduced-R regime (s*s*W >= 128) with a 2-step parallel grid, f32.
    x2 = jax.random.normal(k2, (1, 2, 2, 8, 32), dtype=jnp.float32)
    o2 = jax.block_until_ready(m2(x2))
    assert o2.shape == (1, 2, 2, 16, 64), o2.shape
    np.testing.assert_allclose(
        np.asarray(o2), np.asarray(_reference_anisotropic_upsample(x2, 2)),
        rtol=1e-6, atol=1e-6)

    # 3) bf16 input, odd scale factor (native-MXU precision branch).
    x3 = jax.random.normal(k3, (2, 2, 3, 4, 8), dtype=jnp.bfloat16)
    m3 = AnisotropicUpsample(scale_factor=3)
    o3 = jax.block_until_ready(m3(x3))
    assert o3.shape == (2, 2, 3, 12, 24), o3.shape
    np.testing.assert_array_equal(
        np.asarray(o3.astype(jnp.float32)),
        np.asarray(_reference_anisotropic_upsample(x3, 3).astype(jnp.float32)))

    print("KERNEL_OK")
</pallas_src>

<mosaic_0001>
module attributes {stable_mosaic.version = 11 : i64} {
  func.func @_upsample_kernel(%arg0: i32, %arg1: memref<24x64xf32, #tpu.memory_space<vmem>>, %arg2: memref<64x256xf32, #tpu.memory_space<vmem>>, %arg3: memref<24x256xf32, #tpu.memory_space<vmem>>) attributes {dimension_semantics = [#tpu.dimension_semantics<parallel>], iteration_bounds = array<i64: 1>, scalar_prefetch = 0 : i64, scratch_operands = 0 : i64, tpu.core_type = #tpu.core_type<tc>, window_params = [{transform_indices = @transform_0, window_bounds = array<i64: 24, 64>}, {pipeline_mode = #tpu.pipeline_mode<synchronous>, transform_indices = @transform_1, window_bounds = array<i64: 64, 256>}, {transform_indices = @transform_2, window_bounds = array<i64: 24, 256>}]} {
    %c0 = arith.constant 0 : index
    %c0_0 = arith.constant 0 : index
    %0 = vector.load %arg1[%c0, %c0_0] : memref<24x64xf32, #tpu.memory_space<vmem>>, vector<24x64xf32>
    %c0_1 = arith.constant 0 : index
    %c0_2 = arith.constant 0 : index
    %1 = vector.load %arg2[%c0_1, %c0_2] : memref<64x256xf32, #tpu.memory_space<vmem>>, vector<64x256xf32>
    %cst = arith.constant dense<0.000000e+00> : vector<24x256xf32>
    %2 = tpu.matmul %0, %1, %cst {dimension_numbers = #tpu.dot_dimension_numbers<[1], [0], [0], [1], [0, 0, 1, 1], [], []>, precision = #tpu.contract_precision<fp32>} : vector<24x64xf32>, vector<64x256xf32>, vector<24x256xf32> -> vector<24x256xf32>
    %c0_3 = arith.constant 0 : index
    %c0_4 = arith.constant 0 : index
    %3 = vector.load %arg3[%c0_3, %c0_4] : memref<24x256xf32, #tpu.memory_space<vmem>>, vector<24x256xf32>
    tpu.vector_store %arg3[%c0_3, %c0_4], %2 {strides = array<i32>} : memref<24x256xf32, #tpu.memory_space<vmem>>, vector<24x256xf32>,
    return
  }
  func.func @transform_0(%arg0: i32) -> (i32, i32) {
    %c0_i32 = arith.constant 0 : i32
    %c0_i32_0 = arith.constant 0 : i32
    return %arg0, %c0_i32 : i32, i32
  }
  func.func @transform_1(%arg0: i32) -> (i32, i32) {
    %c0_i32 = arith.constant 0 : i32
    %c0_i32_0 = arith.constant 0 : i32
    %c0_i32_1 = arith.constant 0 : i32
    return %c0_i32, %c0_i32_0 : i32, i32
  }
  func.func @transform_2(%arg0: i32) -> (i32, i32) {
    %c0_i32 = arith.constant 0 : i32
    %c0_i32_0 = arith.constant 0 : i32
    return %arg0, %c0_i32 : i32, i32
  }
}

</mosaic_0001>

<bundles_post_ra>
// kernel: anisotropic_upsample_pallas.1
= control target key start
LH: loop header
LB: loop body
LE: loop exit
PB: predicated region body
PF: predicated region fallthrough
CT: control target
= control target key end

     0   :  { %v922_v3 = vmov 0.0   ;;  %vm30_vm0 = vcmask 523264   ;;  %s1187_s1 = inlined_call_operand.vmem [shape: f32[64,256], index: 1, kind: input, shape index: {}]   ;;  %s1188_s0 = inlined_call_operand.vmem [shape: f32[24,64], index: 0, kind: input, shape index: {}]   ;;  %s1189_s2 = inlined_call_operand.vmem [shape: f32[24,256], index: 2, kind: output, shape index: {}]  }
   0x1   :  { %v15_v0 = vld [vmem:[%s1187_s1 + $0x8] sm:$0xff]  ;;  %v17_v1 = vld [vmem:[%s1187_s1 + $0x18] sm:$0xff]  ;;  %v14_v2 = vld [vmem:[%s1187_s1] sm:$0xff]  ;;  %120 = vmatprep.mubr.f32.mxu1 %v922_v3  ;;  %521 = vmatprep.mubr.f32.mxu0 %v922_v3 }
   0x2   :  { %v40_v4 = vand.u32 4294901760, %v15_v0  ;;  %v44_v5 = vand.u32 4294901760, %v17_v1  ;;  %v16_v6 = vld [vmem:[%s1187_s1 + $0x10] sm:$0xff]  ;;  %v42_v7 = vand.u32 4294901760, %v14_v2  ;;  %v19_v8 = vld [vmem:[%s1187_s1 + $0x28] sm:$0xff]  ;;  %v21_v9 = vld [vmem:[%s1187_s1 + $0x38] sm:$0xff] }
   0x3   :  { %v46_v10 = vand.u32 4294901760, %v16_v6  ;;  %v48_v11 = vand.u32 4294901760, %v19_v8  ;;  %v52_v12 = vand.u32 4294901760, %v21_v9  ;;  %v18_v13 = vld [vmem:[%s1187_s1 + $0x20] sm:$0xff]  ;;  %v20_v14 = vld [vmem:[%s1187_s1 + $0x30] sm:$0xff]  ;;  %v23_v15 = vld [vmem:[%s1187_s1 + $0x48] sm:$0xff] }
   0x4   :  { %v967_v16 = vpack.c.bf16 %v44_v5, %v40_v4  ;;  %v969_v17 = vsub.f32 %v15_v0, %v40_v4  ;;  %v971_v18 = vsub.f32 %v17_v1, %v44_v5  ;;  %v973_v19 = vsub.f32 %v14_v2, %v42_v7  ;;  %v25_v20 = vld [vmem:[%s1187_s1 + $0x58] sm:$0xff]  ;;  %v22_v21 = vld [vmem:[%s1187_s1 + $0x40] sm:$0xff]  ;;  %v24_v22 = vld [vmem:[%s1187_s1 + $0x50] sm:$0xff] }
   0x5   :  { %v984_v23 = vpack.c.bf16 %v46_v10, %v42_v7  ;;  %v986_v24 = vsub.f32 %v16_v6, %v46_v10  ;;  %v988_v25 = vpack.c.bf16 %v52_v12, %v48_v11  ;;  %v990_v26 = vsub.f32 %v19_v8, %v48_v11  ;;  %v27_v27 = vld [vmem:[%s1187_s1 + $0x68] sm:$0xff]  ;;  %v29_v28 = vld [vmem:[%s1187_s1 + $0x78] sm:$0xff]  ;;  %v26_v41 = vld [vmem:[%s1187_s1 + $0x60] sm:$0xff] }
   0x6   :  { %796 = vmatprep.subr.bf16.mxu1 %v967_v16  ;;  %844 = vmatprep.subr.bf16.mxu0 %v967_v16  ;;  %v1000_v29 = vsub.f32 %v21_v9, %v52_v12  ;;  %v50_v30 = vand.u32 4294901760, %v18_v13  ;;  %v54_v31 = vand.u32 4294901760, %v20_v14  ;;  %v56_v32 = vand.u32 4294901760, %v23_v15  ;;  %v28_v42 = vld [vmem:[%s1187_s1 + $0x70] sm:$0xff]  ;;  %v11_v47 = vld [vmem:[%s1188_s0] sm:$0xff] }
   0x7   :  { %798 = vmatpush1.bf16.msra.mxu1 %v984_v23  ;;  %846 = vmatpush1.bf16.msra.mxu0 %v984_v23  ;;  %v60_v33 = vand.u32 4294901760, %v25_v20  ;;  %v58_v34 = vand.u32 4294901760, %v22_v21  ;;  %v62_v35 = vand.u32 4294901760, %v24_v22  ;;  %v64_v36 = vand.u32 4294901760, %v27_v27 }
   0x8   :  { %800 = vmatprep.subr.bf16.mxu1 %v988_v25  ;;  %848 = vmatprep.subr.bf16.mxu0 %v988_v25  ;;  %v1006_v37 = vpack.c.bf16 %v54_v31, %v50_v30  ;;  %v1008_v38 = vsub.f32 %v18_v13, %v50_v30  ;;  %v1010_v39 = vsub.f32 %v20_v14, %v54_v31  ;;  %v68_v40 = vand.u32 4294901760, %v29_v28  ;;  %v12_v30 = vld [vmem:[%s1188_s0 + $0x8] sm:$0xff] }
   0x9   :  { %v1018_v43 = vpack.c.bf16 %v60_v33, %v56_v32  ;;  %v1020_v44 = vsub.f32 %v23_v15, %v56_v32  ;;  %v1022_v45 = vsub.f32 %v25_v20, %v60_v33  ;;  %v1024_v46 = vpack.c.bf16 %v62_v35, %v58_v34 }
   0xa   :  { %v1029_v48 = vsub.f32 %v22_v21, %v58_v34  ;;  %v1031_v49 = vsub.f32 %v24_v22, %v62_v35  ;;  %v1033_v50 = vpack.c.bf16 %v68_v40, %v64_v36  ;;  %v1035_v51 = vsub.f32 %v27_v27, %v64_v36 }
   0xb   :  { %802 = vmatpush1.bf16.msra.mxu1 %v1006_v37  ;;  %850 = vmatpush1.bf16.msra.mxu0 %v1006_v37  ;;  %v1039_v52 = vsub.f32 %v29_v28, %v68_v40  ;;  %v66_v53 = vand.u32 4294901760, %v26_v41  ;;  %v70_v54 = vand.u32 4294901760, %v28_v42  ;;  %v156_v55 = vand.u32 4294901760, %v969_v17 }
   0xc   :  { %804 = vmatprep.subr.bf16.mxu1 %v1018_v43  ;;  %852 = vmatprep.subr.bf16.mxu0 %v1018_v43  ;;  %v168_v56 = vand.u32 4294901760, %v971_v18  ;;  %v32_v57 = vsel %vm30_vm0, %v11_v47, 0  ;;  %v162_v58 = vand.u32 4294901760, %v973_v19  ;;  %v174_v59 = vand.u32 4294901760, %v986_v24 }
   0xd   :  { %v1048_v60 = vpack.c.bf16 %v70_v54, %v66_v53  ;;  %v1050_v61 = vsub.f32 %v26_v41, %v66_v53  ;;  %v1052_v62 = vsub.f32 %v28_v42, %v70_v54  ;;  %v157_v63 = vsub.f32 %v969_v17, %v156_v55 }
   0xe   :  { %v169_v0 = vsub.f32 %v971_v18, %v168_v56  ;;  %v859_v1 = vpack.c.bf16 %v168_v56, %v156_v55  ;;  %v1056_v2 = vand.u32 4294901760, %v32_v57  ;;  %v163_v4 = vsub.f32 %v973_v19, %v162_v58 }
   0xf   :  { %806 = vmatpush1.bf16.msra.mxu1 %v1024_v46  ;;  %854 = vmatpush1.bf16.msra.mxu0 %v1024_v46  ;;  %v158_v5 = vand.u32 4294901760, %v157_v63  ;;  %v175_v6 = vsub.f32 %v986_v24, %v174_v59  ;;  %v861_v7 = vpack.c.bf16 %v174_v59, %v162_v58  ;;  %v180_v8 = vand.u32 4294901760, %v990_v26  ;;  %v13_v59 = vld [vmem:[%s1188_s0 + $0x10] sm:$0xff] }
  0x10   :  { %808 = vmatprep.subr.bf16.mxu1 %v1033_v50  ;;  %856 = vmatprep.subr.bf16.mxu0 %v1033_v50  ;;  %v170_v9 = vand.u32 4294901760, %v169_v0  ;;  %v1066_v10 = vsub.f32 %v32_v57, %v1056_v2  ;;  %v164_v11 = vand.u32 4294901760, %v163_v4  ;;  %v192_v12 = vand.u32 4294901760, %v1000_v29 }
  0x11   :  { %v176_v13 = vand.u32 4294901760, %v175_v6  ;;  %v181_v14 = vsub.f32 %v990_v26, %v180_v8  ;;  %v186_v15 = vand.u32 4294901760, %v1008_v38  ;;  %v198_v20 = vand.u32 4294901760, %v1010_v39 }
  0x12   :  { %v811_v21 = vpack.c.bf16 %v170_v9, %v158_v5  ;;  %v123_v22 = vand.u32 4294901760, %v1066_v10  ;;  %v193_v27 = vsub.f32 %v1000_v29, %v192_v12  ;;  %v863_v28 = vpack.c.bf16 %v192_v12, %v180_v8 }
  0x13   :  { %810 = vmatpush1.bf16.msra.mxu1 %v1048_v60  ;;  %858 = vmatpush1.bf16.msra.mxu0 %v1048_v60  ;;  %v813_v31 = vpack.c.bf16 %v176_v13, %v164_v11  ;;  %v182_v32 = vand.u32 4294901760, %v181_v14  ;;  %v187_v33 = vsub.f32 %v1008_v38, %v186_v15  ;;  %v199_v34 = vsub.f32 %v1010_v39, %v198_v20 }
  0x14   :  { %812 = vmatprep.subr.bf16.mxu1 %v811_v21  ;;  %860 = vmatprep.subr.bf16.mxu0 %v859_v1  ;;  %v124_v35 = vsub.f32 %v1066_v10, %v123_v22  ;;  %v194_v36 = vand.u32 4294901760, %v193_v27  ;;  %v865_v40 = vpack.c.bf16 %v198_v20, %v186_v15  ;;  %v204_v41 = vand.u32 4294901760, %v1020_v44 }
  0x15   :  { %v188_v42 = vand.u32 4294901760, %v187_v33  ;;  %v200_v47 = vand.u32 4294901760, %v199_v34  ;;  %v216_v53 = vand.u32 4294901760, %v1022_v45  ;;  %v35_v54 = vsel %vm30_vm0, %v12_v30, 0 }
  0x16   :  { %v125_v55 = vand.u32 4294901760, %v124_v35  ;;  %525 = vmatmul.mubr.f32.vlgmr.msra.gmra.mrb[0].mxu0 %v123_v22  ;;  %v815_v56 = vpack.c.bf16 %v194_v36, %v182_v32  ;;  %v205_v57 = vsub.f32 %v1020_v44, %v204_v41  ;;  %v1086_v58 = vand.u32 4294901760, %v35_v54 }
  0x17   :  { %862 = vmatpush1.bf16.msra.mxu0 %v861_v7  ;;  %v817_v63 = vpack.c.bf16 %v200_v47, %v188_v42  ;;  %v217_v0 = vsub.f32 %v1022_v45, %v216_v53  ;;  %530 = vmatprep.mubr.f32.mxu0 %v922_v3  ;;  %v867_v1 = vpack.c.bf16 %v216_v53, %v204_v41  ;;  %v210_v4 = vand.u32 4294901760, %v1029_v48 }
  0x18   :  { %126 = vmatmul.mubr.f32.vlgmr.msra.gmra.mrb[0].mxu1 %v125_v55  ;;  %864 = vmatprep.subr.bf16.mxu0 %v863_v28  ;;  %v206_v5 = vand.u32 4294901760, %v205_v57  ;;  %v1095_v6 = vsub.f32 %v35_v54, %v1086_v58  ;;  %v222_v8 = vand.u32 4294901760, %v1031_v49  ;;  %v228_v9 = vand.u32 4294901760, %v1035_v51 }
  0x19   :  { %814 = vmatpush1.bf16.msra.mxu1 %v813_v31  ;;  %131 = vmatprep.mubr.f32.mxu1 %v922_v3  ;;  %v218_v7 = vand.u32 4294901760, %v217_v0  ;;  %v211_v11 = vsub.f32 %v1029_v48, %v210_v4  ;;  %v240_v12 = vand.u32 4294901760, %v1039_v52  ;;  %v38_v13 = vsel %vm30_vm0, %v13_v59, 0 }
  0x1a   :  { %816 = vmatprep.subr.bf16.mxu1 %v815_v56  ;;  %v134_v14 = vand.u32 4294901760, %v1095_v6  ;;  %v223_v15 = vsub.f32 %v1031_v49, %v222_v8  ;;  %v869_v20 = vpack.c.bf16 %v222_v8, %v210_v4  ;;  %v229_v21 = vsub.f32 %v1035_v51, %v228_v9 }
  0x1b   :  { %866 = vmatpush1.bf16.msra.mxu0 %v865_v40  ;;  %v819_v22 = vpack.c.bf16 %v218_v7, %v206_v5  ;;  %v212_v27 = vand.u32 4294901760, %v211_v11  ;;  %v241_v28 = vsub.f32 %v1039_v52, %v240_v12  ;;  %v871_v30 = vpack.c.bf16 %v240_v12, %v228_v9 }
  0x1c   :  { %868 = vmatprep.subr.bf16.mxu0 %v867_v1  ;;  %v135_v31 = vsub.f32 %v1095_v6, %v134_v14  ;;  %v224_v32 = vand.u32 4294901760, %v223_v15  ;;  %534 = vmatmul.mubr.f32.gmra.mrb[2].mxu0 %v134_v14  ;;  %v230_v33 = vand.u32 4294901760, %v229_v21  ;;  %v1108_v34 = vand.u32 4294901760, %v38_v13 }
  0x1d   :  { %818 = vmatpush1.bf16.msra.mxu1 %v817_v63  ;;  %v242_v35 = vand.u32 4294901760, %v241_v28  ;;  %539 = vmatprep.mubr.f32.mxu0 %v922_v3  ;;  %v234_v36 = vand.u32 4294901760, %v1050_v61  ;;  %v246_v40 = vand.u32 4294901760, %v1052_v62  ;;  %v827_v1 = vpack.c.bf16 %v971_v18, %v969_v17 }
  0x1e   :  { %820 = vmatprep.subr.bf16.mxu1 %v819_v22  ;;  %v136_v41 = vand.u32 4294901760, %v135_v31  ;;  %v821_v42 = vpack.c.bf16 %v224_v32, %v212_v27  ;;  %v1114_v47 = vsub.f32 %v38_v13, %v1108_v34  ;;  %v829_v8 = vpack.c.bf16 %v986_v24, %v973_v19 }
  0x1f   :  { %870 = vmatpush1.bf16.msra.mxu0 %v869_v20  ;;  %v823_v53 = vpack.c.bf16 %v242_v35, %v230_v33  ;;  %v235_v54 = vsub.f32 %v1050_v61, %v234_v36  ;;  %v247_v55 = vsub.f32 %v1052_v62, %v246_v40  ;;  %v873_v56 = vpack.c.bf16 %v246_v40, %v234_v36 }
  0x20   :  { %137 = vmatmul.mubr.f32.gmra.mrb[2].mxu1 %v136_v41  ;;  %872 = vmatprep.subr.bf16.mxu0 %v871_v30  ;;  %v145_v57 = vand.u32 4294901760, %v1114_v47  ;;  %v831_v17 = vpack.c.bf16 %v1000_v29, %v990_v26  ;;  %v835_v18 = vpack.c.bf16 %v1022_v45, %v1020_v44  ;;  %v837_v19 = vpack.c.bf16 %v1031_v49, %v1029_v48 }
  0x21   :  { %822 = vmatpush1.bf16.msra.mxu1 %v821_v42  ;;  %142 = vmatprep.mubr.f32.mxu1 %v922_v3  ;;  %v236_v59 = vand.u32 4294901760, %v235_v54  ;;  %v248_v63 = vand.u32 4294901760, %v247_v55  ;;  %v841_v24 = vpack.c.bf16 %v1052_v62, %v1050_v61 }
  0x22   :  { %824 = vmatprep.subr.bf16.mxu1 %v823_v53  ;;  %v146_v0 = vsub.f32 %v1114_v47, %v145_v57  ;;  %543 = vmatmul.mubr.f32.gmra.mrb[4].mxu0 %v145_v57 }
  0x23   :  { %v825_v4 = vpack.c.bf16 %v248_v63, %v236_v59  ;;  %874 = vmatpush1.bf16.msra.mxu0 %v873_v56  ;;  %661 = vmatprep.mubr.f32.mxu0 %v922_v3 }
  0x24   :  { %v147_v5 = vand.u32 4294901760, %v146_v0  ;;  %876 = vmatprep.subr.bf16.mxu0 %v967_v16  ;;  %v833_v16 = vpack.c.bf16 %v1010_v39, %v1008_v38 }
  0x25   :  { %826 = vmatpush1.bf16.msra.mxu1 %v825_v4 }
  0x26   :  { %148 = vmatmul.mubr.f32.gmra.mrb[4].mxu1 %v147_v5  ;;  %828 = vmatprep.subr.bf16.mxu1 %v827_v1 }
  0x27   :  { %298 = vmatprep.mubr.f32.mxu1 %v922_v3  ;;  %663 = vmatmul.mubr.f32.vlgmr.msra.gmra.mrb[0].mxu0 %v1056_v2 }
  0x28   :  { %878 = vmatpush1.bf16.msra.mxu0 %v984_v23  ;;  %668 = vmatprep.mubr.f32.mxu0 %v922_v3  ;;  %v839_v23 = vpack.c.bf16 %v1039_v52, %v1035_v51 }
  0x29   :  { %880 = vmatprep.subr.bf16.mxu0 %v988_v25 }
  0x2a   :  { %300 = vmatmul.mubr.f32.vlgmr.msra.gmra.mrb[0].mxu1 %v1056_v2 }
  0x2b   :  { %830 = vmatpush1.bf16.msra.mxu1 %v829_v8  ;;  %305 = vmatprep.mubr.f32.mxu1 %v922_v3 }
  0x2c   :  { %832 = vmatprep.subr.bf16.mxu1 %v831_v17  ;;  %882 = vmatpush1.bf16.msra.mxu0 %v1006_v37 }
  0x2d   :  { %670 = vmatmul.mubr.f32.gmra.mrb[2].mxu0 %v1086_v58  ;;  %884 = vmatprep.subr.bf16.mxu0 %v1018_v43 }
  0x2e   :  { %307 = vmatmul.mubr.f32.gmra.mrb[2].mxu1 %v1086_v58  ;;  %675 = vmatprep.mubr.f32.mxu0 %v922_v3 }
  0x2f   :  { %834 = vmatpush1.bf16.msra.mxu1 %v833_v16  ;;  %312 = vmatprep.mubr.f32.mxu1 %v922_v3 }
  0x30   :  { %836 = vmatprep.subr.bf16.mxu1 %v835_v18  ;;  %886 = vmatpush1.bf16.msra.mxu0 %v1024_v46 }
  0x31   :  { %677 = vmatmul.mubr.f32.gmra.mrb[4].mxu0 %v1108_v34  ;;  %888 = vmatprep.subr.bf16.mxu0 %v1033_v50 }
  0x32   :  { %314 = vmatmul.mubr.f32.gmra.mrb[4].mxu1 %v1108_v34  ;;  %763 = vmatprep.mubr.f32.mxu0 %v922_v3 }
  0x33   :  { %838 = vmatpush1.bf16.msra.mxu1 %v837_v19  ;;  %416 = vmatprep.mubr.f32.mxu1 %v922_v3 }
  0x34   :  { %840 = vmatprep.subr.bf16.mxu1 %v839_v23  ;;  %890 = vmatpush1.bf16.msra.mxu0 %v1048_v60 }
  0x37   :  { %842 = vmatpush1.bf16.msra.mxu1 %v841_v24  ;;  %765 = vmatmul.mubr.f32.vlgmr.msra.gmra.mrb[0].mxu0 %v1056_v2 }
  0x38   :  { %770 = vmatprep.mubr.f32.mxu0 %v922_v3 }
  0x3a   :  { %419 = vmatmul.mubr.f32.vlgmr.msra.gmra.mrb[0].mxu1 %v1066_v10 }
  0x3b   :  { %424 = vmatprep.mubr.f32.mxu1 %v922_v3  ;;  %772 = vmatmul.mubr.f32.gmra.mrb[2].mxu0 %v1086_v58 }
  0x3c   :  { %777 = vmatprep.mubr.f32.mxu0 %v922_v3 }
  0x3e   :  { %427 = vmatmul.mubr.f32.gmra.mrb[2].mxu1 %v1095_v6 }
  0x3f   :  { %432 = vmatprep.mubr.f32.mxu1 %v922_v3  ;;  %779 = vmatmul.mubr.f32.gmra.mrb[4].mxu0 %v1108_v34 }
  0x42   :  { %435 = vmatmul.mubr.f32.gmra.mrb[4].mxu1 %v1114_v47 }
 0x10a   :  { %v766_v25 = vpop.f32.mrb[0].mxu0 }
 0x10b   :  { %v768_v26 = vpop.f32.mrb[1].mxu0 }
 0x10d   :  { %v420_v29 = vpop.f32.mrb[0].mxu1 }
 0x10e   :  { %v891_v37 = vadd.f32 %v766_v25, %v420_v29  ;;  %v422_v38 = vpop.f32.mrb[1].mxu1  ;;  %v773_v39 = vpop.f32.mrb[2].mxu0 }
 0x10f   :  { %v892_v43 = vadd.f32 %v768_v26, %v422_v38  ;;  %v775_v44 = vpop.f32.mrb[3].mxu0 }
 0x110   :  { %785 = vst [vmem:[%s1189_s2] sm:$0xff] %v891_v37 }
 0x111   :  { %786 = vst [vmem:[%s1189_s2 + $0x8] sm:$0xff] %v892_v43  ;;  %v428_v3 = vpop.f32.mrb[2].mxu1 }
 0x112   :  { %v893_v45 = vadd.f32 %v773_v39, %v428_v3  ;;  %v430_v46 = vpop.f32.mrb[3].mxu1  ;;  %v780_v48 = vpop.f32.mrb[4].mxu0 }
 0x113   :  { %v894_v49 = vadd.f32 %v775_v44, %v430_v46  ;;  %v782_v50 = vpop.f32.mrb[5].mxu0 }
 0x114   :  { %787 = vst [vmem:[%s1189_s2 + $0x10] sm:$0xff] %v893_v45 }
 0x115   :  { %788 = vst [vmem:[%s1189_s2 + $0x18] sm:$0xff] %v894_v49  ;;  %v436_v51 = vpop.f32.mrb[4].mxu1 }
 0x116   :  { %v895_v52 = vadd.f32 %v780_v48, %v436_v51  ;;  %v438_v60 = vpop.f32.mrb[5].mxu1 }
 0x117   :  { %v896_v61 = vadd.f32 %v782_v50, %v438_v60 }
 0x118   :  { %789 = vst [vmem:[%s1189_s2 + $0x20] sm:$0xff] %v895_v52 }
 0x119   :  { %790 = vst [vmem:[%s1189_s2 + $0x28] sm:$0xff] %v896_v61 }

</bundles_post_ra>
